<compile_context>
chip_gen: v7x
topology: tpu7x:2x2x1
jax: 0.10.0
libtpu: 0.0.40
codegen_flags: <defaults>
</compile_context>

<pallas_src>
import functools
import math

import jax
import jax.numpy as jnp
from jax.experimental import pallas as pl
from jax.experimental.pallas import tpu as pltpu


# --------------------------------------------------------------------------- #
# Kernel
# --------------------------------------------------------------------------- #
def layernorm_kernel(x_ref, w_ref, b_ref, o_ref, *, eps):
    # x: (row_block, C); w/b: (1, C) broadcast over rows (sublanes)
    x = x_ref[...].astype(jnp.float32)
    mu = jnp.mean(x, axis=-1, keepdims=True)            # XLU lane reduce
    xc = x - mu
    var = jnp.mean(xc * xc, axis=-1, keepdims=True)     # unbiased=False
    inv = jax.lax.rsqrt(var + eps)                       # EUP, not VPU div
    y = xc * inv * w_ref[...].astype(jnp.float32) + b_ref[...].astype(jnp.float32)
    o_ref[...] = y.astype(o_ref.dtype)


# --------------------------------------------------------------------------- #
# Row-block selection: largest multiple-of-8 slab that keeps the
# double-buffered input + output tiles inside a conservative VMEM budget.
# --------------------------------------------------------------------------- #
def _pick_row_block(n, c, itemsize, *, max_rb=1024, vmem_budget=16 << 20):
    if n < 8:
        return n                                    # full-extent block (legal)
    # 2 buffers (pipeline) x (in + out) = 4 slabs of rb*c*itemsize bytes.
    cap = vmem_budget // max(4 * c * itemsize, 1)
    cap = max(8, (cap // 8) * 8)
    cap = min(cap, max_rb)
    rb = min(cap, ((n + 7) // 8) * 8)               # round n up to sublane tile
    return rb


# --------------------------------------------------------------------------- #
# Wrapper
# --------------------------------------------------------------------------- #
def with_bias_layer_norm(x, weight, bias, *, eps=1e-5):
    """LayerNorm over the last axis of x (any leading shape)."""
    orig_shape = x.shape
    c = orig_shape[-1]
    n = math.prod(orig_shape[:-1]) if len(orig_shape) > 1 else 1
    x2 = x.reshape(n, c)

    rb = _pick_row_block(n, c, jnp.dtype(x.dtype).itemsize)
    grid = (pl.cdiv(n, rb),)                        # masked last block, no pad copy

    w2 = weight.reshape(1, c).astype(x.dtype)
    b2 = bias.reshape(1, c).astype(x.dtype)

    out = pl.pallas_call(
        functools.partial(layernorm_kernel, eps=eps),
        out_shape=jax.ShapeDtypeStruct((n, c), x.dtype),
        grid=grid,
        in_specs=[
            pl.BlockSpec((rb, c), lambda i: (i, 0)),   # x rows, C lane-dense
            pl.BlockSpec((1, c), lambda i: (0, 0)),    # weight (VMEM resident)
            pl.BlockSpec((1, c), lambda i: (0, 0)),    # bias   (VMEM resident)
        ],
        out_specs=pl.BlockSpec((rb, c), lambda i: (i, 0)),
        compiler_params=pltpu.CompilerParams(
            dimension_semantics=("parallel",)),
    )(x2, w2, b2)

    return out.reshape(orig_shape)


# --------------------------------------------------------------------------- #
# Pure-JAX reference (mirrors the PyTorch forward) for validation
# --------------------------------------------------------------------------- #
def reference_forward(x, weight, bias, eps=1e-5):
    mu = jnp.mean(x, axis=-1, keepdims=True)
    var = jnp.mean((x - mu) ** 2, axis=-1, keepdims=True)   # unbiased=False
    return (x - mu) / jnp.sqrt(var + eps) * weight + bias


# --------------------------------------------------------------------------- #
# Demo / self-test
# --------------------------------------------------------------------------- #
if __name__ == "__main__":
    key = jax.random.PRNGKey(0)
    kx, kw, kb, kx2 = jax.random.split(key, 4)

    # Typical use in the transformer: x reshaped to (batch, h*w tokens, channels)
    b, tokens, c = 2, 64, 128
    x = jax.random.normal(kx, (b, tokens, c), jnp.float32)
    # Module inits weight=1, bias=0; use perturbed values so the affine part
    # is actually exercised by the check.
    weight = 1.0 + 0.1 * jax.random.normal(kw, (c,), jnp.float32)
    bias = 0.1 * jax.random.normal(kb, (c,), jnp.float32)

    out = with_bias_layer_norm(x, weight, bias)
    out = jax.block_until_ready(out)
    assert out.shape == x.shape
    ref = reference_forward(x, weight, bias)
    err = float(jnp.max(jnp.abs(out - ref)))
    assert err < 1e-4, f"max abs error too large: {err}"

    # Ragged row count (N not a multiple of the row block / sublane tile):
    # exercises the masked-last-block path (no host-side padding copy).
    x_r = jax.random.normal(kx2, (3, 50, c), jnp.float32)
    out_r = jax.block_until_ready(with_bias_layer_norm(x_r, weight, bias))
    err_r = float(jnp.max(jnp.abs(out_r - reference_forward(x_r, weight, bias))))
    assert err_r < 1e-4, f"ragged-case max abs error too large: {err_r}"

    print("KERNEL_OK")
</pallas_src>

<mosaic_0001>
module attributes {stable_mosaic.version = 11 : i64} {
  func.func @layernorm_kernel(%arg0: i32, %arg1: memref<128x128xf32, #tpu.memory_space<vmem>>, %arg2: memref<1x128xf32, #tpu.memory_space<vmem>>, %arg3: memref<1x128xf32, #tpu.memory_space<vmem>>, %arg4: memref<128x128xf32, #tpu.memory_space<vmem>>) attributes {dimension_semantics = [#tpu.dimension_semantics<parallel>], iteration_bounds = array<i64: 1>, scalar_prefetch = 0 : i64, scratch_operands = 0 : i64, tpu.core_type = #tpu.core_type<tc>, window_params = [{transform_indices = @transform_0, window_bounds = array<i64: 128, 128>}, {pipeline_mode = #tpu.pipeline_mode<synchronous>, transform_indices = @transform_1, window_bounds = array<i64: 1, 128>}, {pipeline_mode = #tpu.pipeline_mode<synchronous>, transform_indices = @transform_2, window_bounds = array<i64: 1, 128>}, {transform_indices = @transform_3, window_bounds = array<i64: 128, 128>}]} {
    %c0 = arith.constant 0 : index
    %c0_0 = arith.constant 0 : index
    %0 = vector.load %arg1[%c0, %c0_0] : memref<128x128xf32, #tpu.memory_space<vmem>>, vector<128x128xf32>
    %cst = arith.constant dense<0.000000e+00> : vector<128xf32>
    %1 = vector.multi_reduction <add>, %0, %cst [1] : vector<128x128xf32> to vector<128xf32>
    %2 = vector.shape_cast %1 : vector<128xf32> to vector<128x1xf32>
    %cst_1 = arith.constant 1.280000e+02 : f32
    %3 = vector.broadcast %cst_1 : f32 to vector<128x1xf32>
    %4 = arith.divf %2, %3 : vector<128x1xf32>
    %5 = vector.broadcast %4 : vector<128x1xf32> to vector<128x128xf32>
    %6 = arith.subf %0, %5 : vector<128x128xf32>
    %7 = arith.mulf %6, %6 : vector<128x128xf32>
    %cst_2 = arith.constant dense<0.000000e+00> : vector<128xf32>
    %8 = vector.multi_reduction <add>, %7, %cst_2 [1] : vector<128x128xf32> to vector<128xf32>
    %9 = vector.shape_cast %8 : vector<128xf32> to vector<128x1xf32>
    %cst_3 = arith.constant 1.280000e+02 : f32
    %10 = vector.broadcast %cst_3 : f32 to vector<128x1xf32>
    %11 = arith.divf %9, %10 : vector<128x1xf32>
    %cst_4 = arith.constant 9.99999974E-6 : f32
    %12 = vector.broadcast %cst_4 : f32 to vector<128x1xf32>
    %13 = arith.addf %11, %12 : vector<128x1xf32>
    %14 = math.rsqrt %13 : vector<128x1xf32>
    %15 = vector.broadcast %14 : vector<128x1xf32> to vector<128x128xf32>
    %16 = arith.mulf %6, %15 : vector<128x128xf32>
    %c0_5 = arith.constant 0 : index
    %c0_6 = arith.constant 0 : index
    %17 = vector.load %arg2[%c0_5, %c0_6] : memref<1x128xf32, #tpu.memory_space<vmem>>, vector<1x128xf32>
    %18 = vector.broadcast %17 : vector<1x128xf32> to vector<128x128xf32>
    %19 = arith.mulf %16, %18 : vector<128x128xf32>
    %c0_7 = arith.constant 0 : index
    %c0_8 = arith.constant 0 : index
    %20 = vector.load %arg3[%c0_7, %c0_8] : memref<1x128xf32, #tpu.memory_space<vmem>>, vector<1x128xf32>
    %21 = vector.broadcast %20 : vector<1x128xf32> to vector<128x128xf32>
    %22 = arith.addf %19, %21 : vector<128x128xf32>
    %c0_9 = arith.constant 0 : index
    %c0_10 = arith.constant 0 : index
    %23 = vector.load %arg4[%c0_9, %c0_10] : memref<128x128xf32, #tpu.memory_space<vmem>>, vector<128x128xf32>
    tpu.vector_store %arg4[%c0_9, %c0_10], %22 {strides = array<i32>} : memref<128x128xf32, #tpu.memory_space<vmem>>, vector<128x128xf32>,
    return
  }
  func.func @transform_0(%arg0: i32) -> (i32, i32) {
    %c0_i32 = arith.constant 0 : i32
    %c0_i32_0 = arith.constant 0 : i32
    return %arg0, %c0_i32 : i32, i32
  }
  func.func @transform_1(%arg0: i32) -> (i32, i32) {
    %c0_i32 = arith.constant 0 : i32
    %c0_i32_0 = arith.constant 0 : i32
    %c0_i32_1 = arith.constant 0 : i32
    return %c0_i32, %c0_i32_0 : i32, i32
  }
  func.func @transform_2(%arg0: i32) -> (i32, i32) {
    %c0_i32 = arith.constant 0 : i32
    %c0_i32_0 = arith.constant 0 : i32
    %c0_i32_1 = arith.constant 0 : i32
    return %c0_i32, %c0_i32_0 : i32, i32
  }
  func.func @transform_3(%arg0: i32) -> (i32, i32) {
    %c0_i32 = arith.constant 0 : i32
    %c0_i32_0 = arith.constant 0 : i32
    return %arg0, %c0_i32 : i32, i32
  }
}

</mosaic_0001>

<bundles_post_ra>
// kernel: tpu_custom_call.1
= control target key start
LH: loop header
LB: loop body
LE: loop exit
PB: predicated region body
PF: predicated region fallthrough
CT: control target
= control target key end

     0   :  { %8 = vsyncpa [#allocation3], 0  ;;  %s583_s0 = inlined_call_operand.hbm [shape: f32[128,128], index: 0, kind: input, shape index: {}]   ;;  %s584_s1 = inlined_call_operand.vmem [shape: f32[1,128], index: 1, kind: input, shape index: {}]   ;;  %s585_s2 = inlined_call_operand.vmem [shape: f32[1,128], index: 2, kind: input, shape index: {}]   ;;  %s586_s3 = inlined_call_operand.hbm [shape: f32[128,128], index: 3, kind: output, shape index: {}]  }
   0x1   :  { %9 = vsyncpa [#allocation4], 0  ;;  %s387_s12 = smov [#allocation2]   ;;  %s339_s16 = scalar_lea.hbm %s583_s0, 2048 }
   0x2   :  { %s15_s13 = sshll.u32 %s387_s12, 4  ;;  %p340_p0 = scmp.ne.s32.totalorder %s583_s0, %s339_s16  ;;  %s16_s13 = int_to_ptr.vmem [resolvable:$true] %s15_s13 }
   0x3   :  { %p343_p1 = scmp.lt.u32.totalorder %s339_s16, %s583_s0 }
   0x5   :  { %p345_p2 = pnand %p343_p1, %p340_p0 }
   0x7   :  { %348 = shalt.err (!%p345_p2)
}
   0x8   :  { %s349_s21 = scalar_lea.vmem %s16_s13, 2048  ;;  %p354_p4 = scmp.lt.s32.totalorder %s16_s13, %s16_s13 }
   0x9   :  { %p350_p3 = scmp.ne.s32.totalorder %s16_s13, %s349_s21  ;;  %p355_p5 = scmp.lt.s32.totalorder %s349_s21, %s349_s21 }
   0xb   :  { %p356_p6 = por %p355_p5, %p354_p4 }
   0xd   :  { %p357_p7 = pnand %p356_p6, %p350_p3 }
   0xf   :  { %360 = shalt.err (!%p357_p7)
}
  0x10   :  { %s388_s22 = smov 128   ;;  %s389_s23 = smov 8  }
  0x11   :  { %21 = dma.hbm_to_vmem [thread:$0]  %s583_s0, 2048, %s16_s13, [#allocation3], %s388_s22, %s388_s22, %s389_s23  }
  0x12   :  { %383 = dma.done.wait [#allocation3], 2048  }
  0x13   :  { %384 = vsyncadd [#allocation3], 4294965248  ;;  %v29_v0 = vld [vmem:[#allocation2] sm:$0xff]  ;;  %v31_v1 = vld [vmem:[#allocation2 + $0x10] sm:$0xff] }
  0x14   :  { %45 = vadd.xlane.f32.xlu0 %v29_v0  ;;  %49 = vadd.xlane.f32.xlu1 %v31_v1  ;;  %v30_v2 = vld [vmem:[#allocation2 + $0x8] sm:$0xff]  ;;  %v32_v3 = vld [vmem:[#allocation2 + $0x18] sm:$0xff]  ;;  %v33_v4 = vld [vmem:[#allocation2 + $0x20] sm:$0xff] }
  0x15   :  { %v34_v5 = vld [vmem:[#allocation2 + $0x28] sm:$0xff]  ;;  %v35_v6 = vld [vmem:[#allocation2 + $0x30] sm:$0xff]  ;;  %v36_v7 = vld [vmem:[#allocation2 + $0x38] sm:$0xff] }
  0x16   :  { %v37_v8 = vld [vmem:[#allocation2 + $0x40] sm:$0xff]  ;;  %v38_v9 = vld [vmem:[#allocation2 + $0x48] sm:$0xff]  ;;  %v39_v10 = vld [vmem:[#allocation2 + $0x50] sm:$0xff] }
  0x17   :  { %v426_v11 = vld [vmem:[#allocation2 + $0x58] sm:$0xff]  ;;  %v429_v12 = vld [vmem:[#allocation2 + $0x60] sm:$0xff]  ;;  %v431_v13 = vld [vmem:[#allocation2 + $0x68] sm:$0xff] }
  0x18   :  { %47 = vadd.xlane.f32.xlu0 %v30_v2  ;;  %51 = vadd.xlane.f32.xlu1 %v32_v3  ;;  %v435_v14 = vld [vmem:[#allocation2 + $0x70] sm:$0xff]  ;;  %v437_v15 = vld [vmem:[#allocation2 + $0x78] sm:$0xff] }
  0x1c   :  { %53 = vadd.xlane.f32.xlu0 %v33_v4  ;;  %55 = vadd.xlane.f32.xlu1 %v34_v5 }
  0x20   :  { %57 = vadd.xlane.f32.xlu0 %v35_v6  ;;  %59 = vadd.xlane.f32.xlu1 %v36_v7 }
  0x24   :  { %61 = vadd.xlane.f32.xlu0 %v37_v8  ;;  %63 = vadd.xlane.f32.xlu1 %v38_v9 }
  0x28   :  { %65 = vadd.xlane.f32.xlu0 %v39_v10  ;;  %67 = vadd.xlane.f32.xlu1 %v426_v11 }
  0x2c   :  { %69 = vadd.xlane.f32.xlu0 %v429_v12  ;;  %71 = vadd.xlane.f32.xlu1 %v431_v13 }
  0x30   :  { %73 = vadd.xlane.f32.xlu0 %v435_v14  ;;  %75 = vadd.xlane.f32.xlu1 %v437_v15 }
  0xa1   :  { %v46_v16 = vpop.xlane.xlu0 %45  ;;  %v50_v17 = vpop.xlane.xlu1 %49 }
  0xa2   :  { %v78_v18 = vmul.f32 0.0078125, %v46_v16  ;;  %v80_v19 = vmul.f32 0.0078125, %v50_v17 }
  0xa4   :  { %v441_v20 = vsub.f32 %v29_v0, %v78_v18  ;;  %v443_v21 = vsub.f32 %v31_v1, %v80_v19 }
  0xa5   :  { %v48_v22 = vpop.xlane.xlu0 %47  ;;  %v52_v23 = vpop.xlane.xlu1 %51 }
  0xa6   :  { %v79_v24 = vmul.f32 0.0078125, %v48_v22  ;;  %v110_v25 = vmul.f32 %v441_v20, %v441_v20  ;;  %v81_v26 = vmul.f32 0.0078125, %v52_v23  ;;  %v112_v29 = vmul.f32 %v443_v21, %v443_v21 }
  0xa8   :  { %v447_v27 = vsub.f32 %v30_v2, %v79_v24  ;;  %126 = vadd.xlane.f32.xlu0 %v110_v25  ;;  %v449_v28 = vsub.f32 %v32_v3, %v81_v26 }
  0xa9   :  { %v54_v30 = vpop.xlane.xlu0 %53  ;;  %v56_v31 = vpop.xlane.xlu1 %55 }
  0xaa   :  { %v82_v32 = vmul.f32 0.0078125, %v54_v30  ;;  %v111_v33 = vmul.f32 %v447_v27, %v447_v27  ;;  %v83_v34 = vmul.f32 0.0078125, %v56_v31  ;;  %v113_v37 = vmul.f32 %v449_v28, %v449_v28 }
  0xac   :  { %v455_v35 = vsub.f32 %v33_v4, %v82_v32  ;;  %130 = vadd.xlane.f32.xlu0 %v112_v29  ;;  %128 = vadd.xlane.f32.xlu1 %v111_v33  ;;  %v457_v36 = vsub.f32 %v34_v5, %v83_v34 }
  0xad   :  { %v58_v38 = vpop.xlane.xlu0 %57  ;;  %v60_v39 = vpop.xlane.xlu1 %59 }
  0xae   :  { %v84_v40 = vmul.f32 0.0078125, %v58_v38  ;;  %v114_v41 = vmul.f32 %v455_v35, %v455_v35  ;;  %v85_v42 = vmul.f32 0.0078125, %v60_v39  ;;  %v115_v45 = vmul.f32 %v457_v36, %v457_v36 }
  0xb0   :  { %v463_v43 = vsub.f32 %v35_v6, %v84_v40  ;;  %132 = vadd.xlane.f32.xlu1 %v113_v37  ;;  %134 = vadd.xlane.f32.xlu0 %v114_v41  ;;  %v465_v44 = vsub.f32 %v36_v7, %v85_v42  ;;  %v513_v42 = vld [vmem:[%s584_s1] ss:$0 sm:$0xff]  ;;  %s390_s1 = smov [#allocation5]  }
  0xb1   :  { %v62_v46 = vpop.xlane.xlu0 %61  ;;  %v64_v47 = vpop.xlane.xlu1 %63 }
  0xb2   :  { %v86_v48 = vmul.f32 0.0078125, %v62_v46  ;;  %v116_v49 = vmul.f32 %v463_v43, %v463_v43  ;;  %v87_v50 = vmul.f32 0.0078125, %v64_v47  ;;  %v117_v53 = vmul.f32 %v465_v44, %v465_v44 }
  0xb4   :  { %v471_v51 = vsub.f32 %v37_v8, %v86_v48  ;;  %136 = vadd.xlane.f32.xlu1 %v115_v45  ;;  %138 = vadd.xlane.f32.xlu0 %v116_v49  ;;  %v473_v52 = vsub.f32 %v38_v9, %v87_v50  ;;  %v519_v50 = vld [vmem:[%s585_s2] ss:$0 sm:$0xff]  ;;  %s289_s2 = sshll.u32 %s390_s1, 4  ;;  %s290_s2 = int_to_ptr.vmem [resolvable:$true] %s289_s2 }
  0xb5   :  { %v66_v54 = vpop.xlane.xlu0 %65  ;;  %v68_v55 = vpop.xlane.xlu1 %67  ;;  %s361_s29 = scalar_lea.vmem %s290_s2, 2048  ;;  %p366_p9 = scmp.lt.s32.totalorder %s290_s2, %s290_s2 }
  0xb6   :  { %v88_v56 = vmul.f32 0.0078125, %v66_v54  ;;  %v118_v57 = vmul.f32 %v471_v51, %v471_v51  ;;  %v89_v58 = vmul.f32 0.0078125, %v68_v55  ;;  %v119_v61 = vmul.f32 %v473_v52, %v473_v52  ;;  %p362_p8 = scmp.ne.s32.totalorder %s290_s2, %s361_s29  ;;  %p367_p10 = scmp.lt.s32.totalorder %s361_s29, %s361_s29 }
  0xb8   :  { %v479_v59 = vsub.f32 %v39_v10, %v88_v56  ;;  %140 = vadd.xlane.f32.xlu1 %v117_v53  ;;  %142 = vadd.xlane.f32.xlu0 %v118_v57  ;;  %v482_v60 = vsub.f32 %v426_v11, %v89_v58  ;;  %p368_p11 = por %p367_p10, %p366_p9 }
  0xb9   :  { %v70_v62 = vpop.xlane.xlu0 %69  ;;  %v72_v63 = vpop.xlane.xlu1 %71 }
  0xba   :  { %v90_v0 = vmul.f32 0.0078125, %v70_v62  ;;  %v120_v1 = vmul.f32 %v479_v59, %v479_v59  ;;  %v91_v2 = vmul.f32 0.0078125, %v72_v63  ;;  %v121_v5 = vmul.f32 %v482_v60, %v482_v60  ;;  %p369_p12 = pnand %p368_p11, %p362_p8 }
  0xbc   :  { %v489_v3 = vsub.f32 %v429_v12, %v90_v0  ;;  %144 = vadd.xlane.f32.xlu1 %v119_v61  ;;  %146 = vadd.xlane.f32.xlu0 %v120_v1  ;;  %v492_v4 = vsub.f32 %v431_v13, %v91_v2 }
  0xbd   :  { %v74_v6 = vpop.xlane.xlu0 %73  ;;  %v76_v7 = vpop.xlane.xlu1 %75 }
  0xbe   :  { %v92_v8 = vmul.f32 0.0078125, %v74_v6  ;;  %v122_v9 = vmul.f32 %v489_v3, %v489_v3  ;;  %v93_v10 = vmul.f32 0.0078125, %v76_v7  ;;  %v123_v13 = vmul.f32 %v492_v4, %v492_v4 }
  0xc0   :  { %v499_v11 = vsub.f32 %v435_v14, %v92_v8  ;;  %148 = vadd.xlane.f32.xlu1 %v121_v5  ;;  %150 = vadd.xlane.f32.xlu0 %v122_v9  ;;  %v502_v12 = vsub.f32 %v437_v15, %v93_v10 }
  0xc2   :  { %v124_v16 = vmul.f32 %v499_v11, %v499_v11  ;;  %v125_v17 = vmul.f32 %v502_v12, %v502_v12 }
  0xc4   :  { %152 = vadd.xlane.f32.xlu1 %v123_v13  ;;  %154 = vadd.xlane.f32.xlu0 %v124_v16 }
  0xc8   :  { %156 = vadd.xlane.f32.xlu1 %v125_v17 }
 0x135   :  { %v127_v18 = vpop.xlane.xlu0 %126 }
 0x136   :  { %v158_v14 = vmul.f32 0.0078125, %v127_v18 }
 0x138   :  { %v174_v19 = vadd.f32 1e-05, %v158_v14 }
 0x139   :  { %v129_v22 = vpop.xlane.xlu1 %128  ;;  %v131_v23 = vpop.xlane.xlu0 %130 }
 0x13a   :  { %307 = vrsqrt.f32 %v174_v19  ;;  %v159_v15 = vmul.f32 0.0078125, %v129_v22  ;;  %v160_v24 = vmul.f32 0.0078125, %v131_v23 }
 0x13c   :  { %v175_v25 = vadd.f32 1e-05, %v159_v15  ;;  %v176_v26 = vadd.f32 1e-05, %v160_v24 }
 0x13d   :  { %v133_v29 = vpop.xlane.xlu1 %132  ;;  %v135_v30 = vpop.xlane.xlu0 %134 }
 0x13e   :  { %309 = vrsqrt.f32 %v175_v25  ;;  %v161_v31 = vmul.f32 0.0078125, %v133_v29  ;;  %v162_v32 = vmul.f32 0.0078125, %v135_v30 }
 0x13f   :  { %311 = vrsqrt.f32 %v176_v26 }
 0x140   :  { %v177_v33 = vadd.f32 1e-05, %v161_v31  ;;  %v178_v34 = vadd.f32 1e-05, %v162_v32 }
 0x141   :  { %v137_v37 = vpop.xlane.xlu1 %136  ;;  %v139_v38 = vpop.xlane.xlu0 %138 }
 0x142   :  { %313 = vrsqrt.f32 %v177_v33  ;;  %v163_v39 = vmul.f32 0.0078125, %v137_v37  ;;  %v164_v40 = vmul.f32 0.0078125, %v139_v38 }
 0x143   :  { %315 = vrsqrt.f32 %v178_v34 }
 0x144   :  { %v308_v41 = vpop.eup %307  ;;  %v179_v45 = vadd.f32 1e-05, %v163_v39  ;;  %v180_v46 = vadd.f32 1e-05, %v164_v40 }
 0x145   :  { %v206_v47 = vmul.f32 %v308_v41, %v441_v20  ;;  %v141_v48 = vpop.xlane.xlu1 %140  ;;  %v143_v49 = vpop.xlane.xlu0 %142 }
 0x146   :  { %317 = vrsqrt.f32 %v179_v45  ;;  %v165_v53 = vmul.f32 0.0078125, %v141_v48  ;;  %v166_v54 = vmul.f32 0.0078125, %v143_v49 }
 0x147   :  { %v229_v55 = vmul.f32 %v513_v42, %v206_v47  ;;  %319 = vrsqrt.f32 %v180_v46 }
 0x148   :  { %v310_v56 = vpop.eup %309  ;;  %v181_v57 = vadd.f32 1e-05, %v165_v53  ;;  %v182_v58 = vadd.f32 1e-05, %v166_v54 }
 0x149   :  { %v312_v61 = vpop.eup %311  ;;  %v252_v62 = vadd.f32 %v519_v50, %v229_v55  ;;  %v207_v20 = vmul.f32 %v310_v56, %v447_v27  ;;  %v145_v63 = vpop.xlane.xlu1 %144 }
 0x14a   :  { %v147_v0 = vpop.xlane.xlu0 %146  ;;  %v208_v1 = vmul.f32 %v312_v61, %v443_v21  ;;  %321 = vrsqrt.f32 %v181_v57  ;;  %v167_v2 = vmul.f32 0.0078125, %v145_v63 }
 0x14b   :  { %v168_v5 = vmul.f32 0.0078125, %v147_v0  ;;  %268 = vst [vmem:[#allocation5] sm:$0xff] %v252_v62  ;;  %v230_v6 = vmul.f32 %v513_v42, %v207_v20  ;;  %323 = vrsqrt.f32 %v182_v58 }
 0x14c   :  { %v314_v7 = vpop.eup %313  ;;  %v231_v8 = vmul.f32 %v513_v42, %v208_v1  ;;  %v183_v9 = vadd.f32 1e-05, %v167_v2 }
 0x14d   :  { %v184_v10 = vadd.f32 1e-05, %v168_v5  ;;  %v316_v13 = vpop.eup %315  ;;  %v253_v16 = vadd.f32 %v519_v50, %v230_v6  ;;  %v209_v27 = vmul.f32 %v314_v7, %v449_v28  ;;  %v149_v17 = vpop.xlane.xlu1 %148 }
 0x14e   :  { %v151_v18 = vpop.xlane.xlu0 %150  ;;  %v254_v21 = vadd.f32 %v519_v50, %v231_v8  ;;  %v210_v14 = vmul.f32 %v316_v13, %v455_v35  ;;  %325 = vrsqrt.f32 %v183_v9  ;;  %v169_v19 = vmul.f32 0.0078125, %v149_v17 }
 0x14f   :  { %269 = vst [vmem:[#allocation5 + $0x8] sm:$0xff] %v253_v16  ;;  %v232_v22 = vmul.f32 %v513_v42, %v209_v27  ;;  %327 = vrsqrt.f32 %v184_v10  ;;  %v170_v23 = vmul.f32 0.0078125, %v151_v18 }
 0x150   :  { %v318_v15 = vpop.eup %317  ;;  %270 = vst [vmem:[#allocation5 + $0x10] sm:$0xff] %v254_v21  ;;  %v233_v24 = vmul.f32 %v513_v42, %v210_v14  ;;  %v185_v25 = vadd.f32 1e-05, %v169_v19 }
 0x151   :  { %v320_v26 = vpop.eup %319  ;;  %v255_v28 = vadd.f32 %v519_v50, %v232_v22  ;;  %v211_v29 = vmul.f32 %v318_v15, %v457_v36  ;;  %v186_v30 = vadd.f32 1e-05, %v170_v23  ;;  %v153_v31 = vpop.xlane.xlu1 %152 }
 0x152   :  { %v155_v35 = vpop.xlane.xlu0 %154  ;;  %v256_v32 = vadd.f32 %v519_v50, %v233_v24  ;;  %v212_v33 = vmul.f32 %v320_v26, %v463_v43  ;;  %329 = vrsqrt.f32 %v185_v25  ;;  %v171_v34 = vmul.f32 0.0078125, %v153_v31 }
 0x153   :  { %271 = vst [vmem:[#allocation5 + $0x18] sm:$0xff] %v255_v28  ;;  %v234_v37 = vmul.f32 %v513_v42, %v211_v29  ;;  %331 = vrsqrt.f32 %v186_v30  ;;  %v172_v38 = vmul.f32 0.0078125, %v155_v35 }
 0x154   :  { %v322_v39 = vpop.eup %321  ;;  %272 = vst [vmem:[#allocation5 + $0x20] sm:$0xff] %v256_v32  ;;  %v235_v40 = vmul.f32 %v513_v42, %v212_v33  ;;  %v187_v41 = vadd.f32 1e-05, %v171_v34 }
 0x155   :  { %v324_v36 = vpop.eup %323  ;;  %v257_v45 = vadd.f32 %v519_v50, %v234_v37  ;;  %v213_v46 = vmul.f32 %v322_v39, %v465_v44  ;;  %v188_v47 = vadd.f32 1e-05, %v172_v38  ;;  %v157_v48 = vpop.xlane.xlu1 %156 }
 0x156   :  { %v258_v43 = vadd.f32 %v519_v50, %v235_v40  ;;  %v214_v49 = vmul.f32 %v324_v36, %v471_v51  ;;  %333 = vrsqrt.f32 %v187_v41  ;;  %v173_v53 = vmul.f32 0.0078125, %v157_v48 }
 0x157   :  { %273 = vst [vmem:[#allocation5 + $0x28] sm:$0xff] %v257_v45  ;;  %v236_v54 = vmul.f32 %v513_v42, %v213_v46  ;;  %335 = vrsqrt.f32 %v188_v47 }
 0x158   :  { %v326_v55 = vpop.eup %325  ;;  %274 = vst [vmem:[#allocation5 + $0x30] sm:$0xff] %v258_v43  ;;  %v237_v56 = vmul.f32 %v513_v42, %v214_v49  ;;  %v189_v57 = vadd.f32 1e-05, %v173_v53 }
 0x159   :  { %v328_v58 = vpop.eup %327  ;;  %v259_v44 = vadd.f32 %v519_v50, %v236_v54  ;;  %v215_v61 = vmul.f32 %v326_v55, %v473_v52 }
 0x15a   :  { %v260_v62 = vadd.f32 %v519_v50, %v237_v56  ;;  %v216_v51 = vmul.f32 %v328_v58, %v479_v59  ;;  %337 = vrsqrt.f32 %v189_v57 }
 0x15b   :  { %275 = vst [vmem:[#allocation5 + $0x38] sm:$0xff] %v259_v44  ;;  %v238_v20 = vmul.f32 %v513_v42, %v215_v61 }
 0x15c   :  { %v330_v63 = vpop.eup %329  ;;  %276 = vst [vmem:[#allocation5 + $0x40] sm:$0xff] %v260_v62  ;;  %v239_v0 = vmul.f32 %v513_v42, %v216_v51 }
 0x15d   :  { %v332_v1 = vpop.eup %331  ;;  %v261_v2 = vadd.f32 %v519_v50, %v238_v20  ;;  %v217_v5 = vmul.f32 %v330_v63, %v482_v60 }
 0x15e   :  { %v262_v6 = vadd.f32 %v519_v50, %v239_v0  ;;  %v218_v52 = vmul.f32 %v332_v1, %v489_v3 }
 0x15f   :  { %277 = vst [vmem:[#allocation5 + $0x48] sm:$0xff] %v261_v2  ;;  %v240_v59 = vmul.f32 %v513_v42, %v217_v5 }
 0x160   :  { %v334_v7 = vpop.eup %333  ;;  %278 = vst [vmem:[#allocation5 + $0x50] sm:$0xff] %v262_v6  ;;  %v241_v8 = vmul.f32 %v513_v42, %v218_v52 }
 0x161   :  { %v336_v9 = vpop.eup %335  ;;  %v263_v10 = vadd.f32 %v519_v50, %v240_v59  ;;  %v219_v13 = vmul.f32 %v334_v7, %v492_v4 }
 0x162   :  { %v264_v16 = vadd.f32 %v519_v50, %v241_v8  ;;  %v220_v60 = vmul.f32 %v336_v9, %v499_v11 }
 0x163   :  { %279 = vst [vmem:[#allocation5 + $0x58] sm:$0xff] %v263_v10  ;;  %v242_v27 = vmul.f32 %v513_v42, %v219_v13 }
 0x164   :  { %v338_v3 = vpop.eup %337  ;;  %280 = vst [vmem:[#allocation5 + $0x60] sm:$0xff] %v264_v16  ;;  %v243_v17 = vmul.f32 %v513_v42, %v220_v60 }
 0x165   :  { %v265_v18 = vadd.f32 %v519_v50, %v242_v27  ;;  %v221_v21 = vmul.f32 %v338_v3, %v502_v12 }
 0x166   :  { %v266_v14 = vadd.f32 %v519_v50, %v243_v17 }
 0x167   :  { %281 = vst [vmem:[#allocation5 + $0x68] sm:$0xff] %v265_v18  ;;  %v244_v4 = vmul.f32 %v513_v42, %v221_v21 }
 0x168   :  { %282 = vst [vmem:[#allocation5 + $0x70] sm:$0xff] %v266_v14 }
 0x169   :  { %v267_v11 = vadd.f32 %v519_v50, %v244_v4 }
 0x16b   :  { %283 = vst [vmem:[#allocation5 + $0x78] sm:$0xff] %v267_v11 }
 0x16c   :  { %372 = shalt.err (!%p369_p12)
}
 0x16d   :  { %s373_s5 = scalar_lea.hbm %s586_s3, 2048 }
 0x16e   :  { %p374_p13 = scmp.ne.s32.totalorder %s586_s3, %s373_s5  ;;  %p377_p0 = scmp.lt.u32.totalorder %s373_s5, %s586_s3 }
 0x170   :  { %p379_p1 = pnand %p377_p0, %p374_p13 }
 0x172   :  { %382 = shalt.err (!%p379_p1)
}
 0x173   :  { %295 = dma.vmem_to_hbm [thread:$0]  %s290_s2, 2048, %s586_s3, [#allocation4], %s388_s22, %s388_s22, %s389_s23  }
 0x174   :  { %385 = dma.done.wait [#allocation4], 2048  }
 0x175   :  { %386 = vsyncadd [#allocation4], 4294965248 }
 0x176   :  { %299 = vsyncpa [#allocation3], 1 }
 0x177   :  { %300 = vsyncpa [#allocation4], 1 }

</bundles_post_ra>
